<compile_context>
chip_gen: v5e
topology: v5e:2x2
jax: 0.10.0
libtpu: 0.0.40
codegen_flags: <defaults>
</compile_context>

<pallas_src>
import jax
import jax.numpy as jnp
from jax.experimental import pallas as pl
from jax.experimental.pallas import tpu as pltpu

# ----------------------------- configuration -------------------------------
B, C, H, W = 2, 4, 16, 16          # small NCHW input
KH, KW = 3, 3                      # conv kernel
NUM_FTRS = 32                      # imem_model.num_ftrs
EMB_DIM = 32                       # word2vec embedding dimension
NUM_LABELS = 1103                  # hard-coded in the PyTorch forward
NUM_CLASSES = NUM_LABELS           # stack([classification, distance], dim=2) requires this
HW = H * W                         # 256
KKC = KH * KW * C                  # 36
KKC_PAD = 64                       # 36 taps + 1 ones row (conv bias) + zero pad
EMB_PAD = 128                      # embedding block padded to one full lane tile
NUM_LABELS_PAD = 1152              # 9 * 128 -> lane-dense classifier block
HEAD_W = EMB_PAD + NUM_LABELS_PAD  # 1280 fused-head width


# ------------------------------ Pallas kernel ------------------------------
def forward_kernel(p_ref, wconv_ref, whead_ref, bhead_ref, out_ref):
    # 3x3 SAME conv as a batched im2col matmul (bf16 in, f32 acc); the conv
    # bias is folded in via the ones row of p_ref / bias column of wconv_ref.
    # Layout keeps HW=256 on the lane axis so the f32 intermediate is
    # lane-dense (~16 vregs).
    conv = jnp.einsum("bfk,bkh->bfh", wconv_ref[...], p_ref[...],
                      preferred_element_type=jnp.float32)      # (B, F, HW) f32
    conv = jnp.maximum(conv, 0.0)                              # ReLU (VPU, f32)

    # Global average pool: lane-axis reduction (XLU); result already in (B, F).
    feat = jnp.sum(conv, axis=-1) * jnp.float32(1.0 / HW)      # (B, F) f32

    # Fused head: [Wemb | pad | Wcls] in a single MXU matmul, f32 bias add,
    # one lane-dense (B, 1280) store.
    head = jnp.dot(feat.astype(jnp.bfloat16), whead_ref[...],
                   preferred_element_type=jnp.float32)         # (B, HEAD_W) f32
    out_ref[...] = head + bhead_ref[...]


# ------------------------------ wrapper (glue) ------------------------------
def _im2col_t(x_nhwc):
    """bf16 im2col in (B, KKC_PAD, HW) layout with a trailing ones row (bias)."""
    xp = jnp.pad(x_nhwc, ((0, 0), (1, 1), (1, 1), (0, 0)))
    cols = [xp[:, i:i + H, j:j + W, :] for i in range(KH) for j in range(KW)]
    patches = jnp.stack(cols, axis=3).reshape(B, HW, KKC)       # (B, HW, KKC)
    pt = jnp.transpose(patches, (0, 2, 1))                      # (B, KKC, HW)
    ones = jnp.ones((B, 1, HW), pt.dtype)                       # conv-bias row
    pad = jnp.zeros((B, KKC_PAD - KKC - 1, HW), pt.dtype)
    return jnp.concatenate([pt, ones, pad], axis=1)             # (B, KKC_PAD, HW)


def model_forward(x_nchw, params):
    # NCHW -> NHWC, cast to bf16 BEFORE im2col (reference stays f32; the
    # 5e-2 tolerance covers the bf16 error budget).
    x = jnp.transpose(x_nchw, (0, 2, 3, 1)).astype(jnp.bfloat16)
    patches = _im2col_t(x)                                      # (B, 64, 256) bf16

    vmem = pl.BlockSpec(memory_space=pltpu.MemorySpace.VMEM)
    head = pl.pallas_call(
        forward_kernel,
        out_shape=jax.ShapeDtypeStruct((B, HEAD_W), jnp.float32),
        in_specs=[vmem] * 4,
        out_specs=vmem,
    )(patches, params["wconv3"], params["whead"], params["bhead"])

    img_embedding = head[:, :EMB_DIM]                           # (B, EMB_DIM)
    classification = head[:, EMB_PAD:EMB_PAD + NUM_LABELS]      # (B, NUM_LABELS)
    # PyTorch forward returns (classification, img_embedding); the cosine
    # distance / combine_classifiers branch is discarded there, so it is
    # intentionally not computed here (per review).
    return classification, img_embedding


# ------------------------- deterministic parameters -------------------------
def init_params(key):
    ks = jax.random.split(key, 6)

    def uni(k, shape, fan_in):
        bound = 1.0 / jnp.sqrt(float(fan_in))
        return jax.random.uniform(k, shape, jnp.float32, -bound, bound)

    # raw f32 parameters (used by the pure-JAX reference)
    wconv = uni(ks[0], (KKC, NUM_FTRS), KKC)          # (36, 32)
    bconv = uni(ks[1], (NUM_FTRS,), KKC)
    wcls = uni(ks[2], (NUM_FTRS, NUM_LABELS), NUM_FTRS)
    bcls = uni(ks[3], (NUM_LABELS,), NUM_FTRS)
    wemb = uni(ks[4], (NUM_FTRS, EMB_DIM), NUM_FTRS)
    bemb = uni(ks[5], (EMB_DIM,), NUM_FTRS)

    # packed conv weight: transposed, bias column at index KKC, zero pad,
    # broadcast over batch for the batched in-kernel einsum.  bf16 for DMA.
    wconv_t = jnp.zeros((NUM_FTRS, KKC_PAD), jnp.float32)
    wconv_t = wconv_t.at[:, :KKC].set(wconv.T)
    wconv_t = wconv_t.at[:, KKC].set(bconv)
    wconv3 = jnp.broadcast_to(wconv_t, (B, NUM_FTRS, KKC_PAD)).astype(jnp.bfloat16)

    # fused head weight [Wemb | pad to 128 | Wcls (padded to 1152)] + f32 bias
    whead = jnp.zeros((NUM_FTRS, HEAD_W), jnp.float32)
    whead = whead.at[:, :EMB_DIM].set(wemb)
    whead = whead.at[:, EMB_PAD:EMB_PAD + NUM_LABELS].set(wcls)
    bhead = jnp.zeros((1, HEAD_W), jnp.float32)
    bhead = bhead.at[0, :EMB_DIM].set(bemb)
    bhead = bhead.at[0, EMB_PAD:EMB_PAD + NUM_LABELS].set(bcls)

    return dict(
        # kernel inputs
        wconv3=wconv3, whead=whead.astype(jnp.bfloat16), bhead=bhead,
        # f32 originals for the reference
        wconv=wconv, bconv=bconv, wcls=wcls, bcls=bcls, wemb=wemb, bemb=bemb)


# ----------------------------- pure-JAX reference ----------------------------
def reference_forward(x_nchw, params):
    x = jnp.transpose(x_nchw, (0, 2, 3, 1)).astype(jnp.float32)
    xp = jnp.pad(x, ((0, 0), (1, 1), (1, 1), (0, 0)))
    cols = [xp[:, i:i + H, j:j + W, :] for i in range(KH) for j in range(KW)]
    patches = jnp.stack(cols, axis=3).reshape(B, HW, KKC)
    conv = jnp.einsum("bpk,kf->bpf", patches, params["wconv"]) + params["bconv"]
    feat = jnp.mean(jnp.maximum(conv, 0.0), axis=1)
    emb = feat @ params["wemb"] + params["bemb"]
    cls = feat @ params["wcls"] + params["bcls"]
    return cls, emb


# ---------------------------------- main ------------------------------------
if __name__ == "__main__":
    key = jax.random.PRNGKey(0)
    kx, kp = jax.random.split(key)
    x = jax.random.normal(kx, (B, C, H, W), dtype=jnp.float32)   # NCHW like PyTorch
    params = init_params(kp)

    cls, emb = jax.jit(model_forward)(x, params)
    jax.block_until_ready((cls, emb))

    assert cls.shape == (B, NUM_CLASSES) and cls.dtype == jnp.float32
    assert emb.shape == (B, EMB_DIM) and emb.dtype == jnp.float32

    cls_ref, emb_ref = reference_forward(x, params)
    assert bool(jnp.allclose(cls, cls_ref, rtol=5e-2, atol=5e-2))
    assert bool(jnp.allclose(emb, emb_ref, rtol=5e-2, atol=5e-2))

    print("KERNEL_OK")
</pallas_src>

<mosaic_0001>
module attributes {stable_mosaic.version = 11 : i64} {
  func.func @forward_kernel(%arg0: memref<2x64x256xbf16, #tpu.memory_space<vmem>>, %arg1: memref<2x32x64xbf16, #tpu.memory_space<vmem>>, %arg2: memref<32x1280xbf16, #tpu.memory_space<vmem>>, %arg3: memref<1x1280xf32, #tpu.memory_space<vmem>>, %arg4: memref<2x1280xf32, #tpu.memory_space<vmem>>) attributes {dimension_semantics = [], scalar_prefetch = 0 : i64, scratch_operands = 0 : i64, tpu.core_type = #tpu.core_type<tc>} {
    %c0 = arith.constant 0 : index
    %c0_0 = arith.constant 0 : index
    %c0_1 = arith.constant 0 : index
    %0 = vector.load %arg1[%c0, %c0_0, %c0_1] : memref<2x32x64xbf16, #tpu.memory_space<vmem>>, vector<2x32x64xbf16>
    %c0_2 = arith.constant 0 : index
    %c0_3 = arith.constant 0 : index
    %c0_4 = arith.constant 0 : index
    %1 = vector.load %arg0[%c0_2, %c0_3, %c0_4] : memref<2x64x256xbf16, #tpu.memory_space<vmem>>, vector<2x64x256xbf16>
    "tpu.trace_start"() <{level = 10 : i32, message = "bfk,bkh->bfh"}> : () -> ()
    %cst = arith.constant dense<0.000000e+00> : vector<2x32x256xf32>
    %2 = tpu.matmul %0, %1, %cst {dimension_numbers = #tpu.dot_dimension_numbers<[2], [1], [1], [2], [0, 0, 0, 1, 1, 2], [0], [0]>} : vector<2x32x64xbf16>, vector<2x64x256xbf16>, vector<2x32x256xf32> -> vector<2x32x256xf32>
    "tpu.trace_stop"() : () -> ()
    %cst_5 = arith.constant 0.000000e+00 : f32
    %3 = vector.broadcast %cst_5 : f32 to vector<2x32x256xf32>
    %4 = arith.maximumf %2, %3 : vector<2x32x256xf32>
    %cst_6 = arith.constant dense<0.000000e+00> : vector<2x32xf32>
    %5 = vector.multi_reduction <add>, %4, %cst_6 [2] : vector<2x32x256xf32> to vector<2x32xf32>
    %cst_7 = arith.constant 3.906250e-03 : f32
    %6 = vector.broadcast %cst_7 : f32 to vector<2x32xf32>
    %7 = arith.mulf %5, %6 : vector<2x32xf32>
    %8 = arith.truncf %7 : vector<2x32xf32> to vector<2x32xbf16>
    %c0_8 = arith.constant 0 : index
    %c0_9 = arith.constant 0 : index
    %9 = vector.load %arg2[%c0_8, %c0_9] : memref<32x1280xbf16, #tpu.memory_space<vmem>>, vector<32x1280xbf16>
    %cst_10 = arith.constant dense<0.000000e+00> : vector<2x1280xf32>
    %10 = tpu.matmul %8, %9, %cst_10 {dimension_numbers = #tpu.dot_dimension_numbers<[1], [0], [0], [1], [0, 0, 1, 1], [], []>} : vector<2x32xbf16>, vector<32x1280xbf16>, vector<2x1280xf32> -> vector<2x1280xf32>
    %c0_11 = arith.constant 0 : index
    %c0_12 = arith.constant 0 : index
    %11 = vector.load %arg3[%c0_11, %c0_12] : memref<1x1280xf32, #tpu.memory_space<vmem>>, vector<1x1280xf32>
    %12 = vector.broadcast %11 : vector<1x1280xf32> to vector<2x1280xf32>
    %13 = arith.addf %10, %12 : vector<2x1280xf32>
    %c0_13 = arith.constant 0 : index
    %c0_14 = arith.constant 0 : index
    %14 = vector.load %arg4[%c0_13, %c0_14] : memref<2x1280xf32, #tpu.memory_space<vmem>>, vector<2x1280xf32>
    tpu.vector_store %arg4[%c0_13, %c0_14], %13 {strides = array<i32>} : memref<2x1280xf32, #tpu.memory_space<vmem>>, vector<2x1280xf32>,
    return
  }
}

</mosaic_0001>

<bundles_post_ra>
// kernel: model_forward.1
= control target key start
LH: loop header
LB: loop body
LE: loop exit
PB: predicated region body
PF: predicated region fallthrough
CT: control target
= control target key end

     0   :  { %vm92_vm0 = vcmask 523264   ;;  %vm344_vm1 = vcmask 130112   ;;  %vm348_vm2 = vcmask 195712   ;;  %vm352_vm3 = vcmask 261312   ;;  %s1138_s0 = inlined_call_operand.vmem [shape: bf16[2,64,256], index: 0, kind: input, shape index: {}]   ;;  %s1139_s1 = inlined_call_operand.vmem [shape: bf16[2,32,64], index: 1, kind: input, shape index: {}]   ;;  %s1140_s2 = inlined_call_operand.vmem [shape: bf16[32,1280], index: 2, kind: input, shape index: {}]   ;;  %s1141_s3 = inlined_call_operand.vmem [shape: f32[1,1280], index: 3, kind: input, shape index: {}]   ;;  %s1142_s4 = inlined_call_operand.vmem [shape: f32[2,1280], index: 4, kind: output, shape index: {}]  }
   0x1   :  { %v669_v0 = vld [vmem:[%s1138_s0 + $0x30] sm:$0xf]  ;;  %v824_v1 = vld [vmem:[%s1138_s0 + $0x34] sm:$0xf0]  ;;  %v823_v2 = vld [vmem:[%s1138_s0 + $0x34] sm:$0xf] }
   0x2   :  { %v670_v3 = vor.u32 %v824_v1, %v669_v0  ;;  %v671_v4 = vld [vmem:[%s1138_s0 + $0x38] sm:$0xf0]  ;;  %v713_v5 = vld [vmem:[%s1138_s0 + $0x70] sm:$0xf]  ;;  %v832_v6 = vld [vmem:[%s1138_s0 + $0x74] sm:$0xf0] }
   0x3   :  { %v674_v7 = vor.u32 %v823_v2, %v671_v4  ;;  %v714_v8 = vor.u32 %v832_v6, %v713_v5  ;;  %v831_v9 = vld [vmem:[%s1138_s0 + $0x74] sm:$0xf]  ;;  %v715_v10 = vld [vmem:[%s1138_s0 + $0x78] sm:$0xf0]  ;;  %v661_v11 = vld [vmem:[%s1138_s0 + $0x20] sm:$0xf] }
   0x4   :  { %103 = vmatpush.bf16.msra.mxu0 %v670_v3  ;;  %v718_v12 = vor.u32 %v831_v9, %v715_v10  ;;  %v822_v13 = vld [vmem:[%s1138_s0 + $0x24] sm:$0xf0]  ;;  %v821_v14 = vld [vmem:[%s1138_s0 + $0x24] sm:$0xf]  ;;  %v663_v15 = vld [vmem:[%s1138_s0 + $0x28] sm:$0xf0] }
   0x5   :  { %122 = vmatpush.bf16.msra.mxu1 %v674_v7  ;;  %197 = vmatpush.bf16.msra.mxu2 %v714_v8  ;;  %v662_v16 = vor.u32 %v822_v13, %v661_v11  ;;  %v666_v17 = vor.u32 %v821_v14, %v663_v15  ;;  %v705_v18 = vld [vmem:[%s1138_s0 + $0x60] sm:$0xf]  ;;  %v830_v19 = vld [vmem:[%s1138_s0 + $0x64] sm:$0xf0]  ;;  %v829_v20 = vld [vmem:[%s1138_s0 + $0x64] sm:$0xf] }
   0x6   :  { %216 = vmatpush.bf16.msra.mxu3 %v718_v12  ;;  %v706_v21 = vor.u32 %v830_v19, %v705_v18  ;;  %v707_v22 = vld [vmem:[%s1138_s0 + $0x68] sm:$0xf0]  ;;  %v653_v23 = vld [vmem:[%s1138_s0 + $0x10] sm:$0xf]  ;;  %v820_v24 = vld [vmem:[%s1138_s0 + $0x14] sm:$0xf0] }
   0x7   :  { %v710_v25 = vor.u32 %v829_v20, %v707_v22  ;;  %v819_v26 = vld [vmem:[%s1138_s0 + $0x14] sm:$0xf]  ;;  %v655_v27 = vld [vmem:[%s1138_s0 + $0x18] sm:$0xf0]  ;;  %v697_v28 = vld [vmem:[%s1138_s0 + $0x50] sm:$0xf]  ;;  %v654_v29 = vor.u32 %v820_v24, %v653_v23 }
   0x8   :  { %104 = vmatpush.bf16.msra.mxu0 %v662_v16  ;;  %v828_v30 = vld [vmem:[%s1138_s0 + $0x54] sm:$0xf0]  ;;  %v827_v31 = vld [vmem:[%s1138_s0 + $0x54] sm:$0xf]  ;;  %v699_v32 = vld [vmem:[%s1138_s0 + $0x58] sm:$0xf0]  ;;  %v658_v33 = vor.u32 %v819_v26, %v655_v27 }
   0x9   :  { %123 = vmatpush.bf16.msra.mxu1 %v666_v17  ;;  %198 = vmatpush.bf16.msra.mxu2 %v706_v21  ;;  %v698_v34 = vor.u32 %v828_v30, %v697_v28  ;;  %v645_v35 = vld [vmem:[%s1138_s0] sm:$0xf]  ;;  %v818_v36 = vld [vmem:[%s1138_s0 + $0x4] sm:$0xf0]  ;;  %v817_v37 = vld [vmem:[%s1138_s0 + $0x4] sm:$0xf]  ;;  %v702_v38 = vor.u32 %v827_v31, %v699_v32 }
   0xa   :  { %217 = vmatpush.bf16.msra.mxu3 %v710_v25  ;;  %v647_v39 = vld [vmem:[%s1138_s0 + $0x8] sm:$0xf0]  ;;  %v689_v40 = vld [vmem:[%s1138_s0 + $0x40] sm:$0xf]  ;;  %v826_v41 = vld [vmem:[%s1138_s0 + $0x44] sm:$0xf0]  ;;  %v646_v44 = vor.u32 %v818_v36, %v645_v35 }
   0xb   :  { %v825_v42 = vld [vmem:[%s1138_s0 + $0x44] sm:$0xf]  ;;  %v691_v43 = vld [vmem:[%s1138_s0 + $0x48] sm:$0xf0]  ;;  %v650_v45 = vor.u32 %v817_v37, %v647_v39  ;;  %v690_v46 = vor.u32 %v826_v41, %v689_v40  ;;  %v815_v49 = vld [vmem:[%s1139_s1 + $0x10] sm:$0xff]  ;;  %vm361_vm4 = vcmask 1041409  }
   0xc   :  { %105 = vmatpush.bf16.msra.mxu0 %v654_v29  ;;  %v694_v47 = vor.u32 %v825_v42, %v691_v43  ;;  %v813_v48 = vld [vmem:[%s1139_s1] sm:$0xff]  ;;  %v814_v50 = vld [vmem:[%s1139_s1 + $0x8] sm:$0xff]  ;;  %v816_v51 = vld [vmem:[%s1139_s1 + $0x18] sm:$0xff]  ;;  %vm464_vm5 = vcmask 261120   ;;  %vm615_vm6 = vcmask 1041408   ;;  %vm617_vm7 = vcmask 1045508  }
   0xd   :  { %124 = vmatpush.bf16.msra.mxu1 %v658_v33  ;;  %199 = vmatpush.bf16.msra.mxu2 %v698_v34  ;;  %v765_v28 = vld [vmem:[%s1140_s2 + $0x50] sm:$0xf]  ;;  %v848_v29 = vld [vmem:[%s1140_s2 + $0x74] sm:$0xf0]  ;;  %v843_v30 = vld [vmem:[%s1140_s2 + $0x54] sm:$0xf] }
   0xe   :  { %218 = vmatpush.bf16.msra.mxu3 %v702_v38  ;;  %v766_v31 = vor.u32 %v848_v29, %v765_v28  ;;  %v767_v32 = vld [vmem:[%s1140_s2 + $0x78] sm:$0xf0]  ;;  %v773_v34 = vld [vmem:[%s1140_s2 + $0x58] sm:$0xf]  ;;  %v849_v35 = vld [vmem:[%s1140_s2 + $0x7c] sm:$0xf0] }
   0xf   :  { %v770_v33 = vor.u32 %v843_v30, %v767_v32  ;;  %v844_v36 = vld [vmem:[%s1140_s2 + $0x5c] sm:$0xf]  ;;  %v774_v37 = vor.u32 %v849_v35, %v773_v34  ;;  %v775_v38 = vld [vmem:[%s1140_s2 + $0x80] sm:$0xf0]  ;;  %v725_v40 = vld [vmem:[%s1140_s2] sm:$0xf] }
  0x10   :  { %106 = vmatpush.bf16.msra.mxu0 %v646_v44  ;;  %v778_v39 = vor.u32 %v844_v36, %v775_v38  ;;  %v838_v41 = vld [vmem:[%s1140_s2 + $0x24] sm:$0xf0]  ;;  %v833_v42 = vld [vmem:[%s1140_s2 + $0x4] sm:$0xf]  ;;  %v727_v44 = vld [vmem:[%s1140_s2 + $0x28] sm:$0xf0] }
  0x11   :  { %125 = vmatpush.bf16.msra.mxu1 %v650_v45  ;;  %200 = vmatpush.bf16.msra.mxu2 %v690_v46  ;;  %v726_v43 = vor.u32 %v838_v41, %v725_v40  ;;  %v730_v45 = vor.u32 %v833_v42, %v727_v44  ;;  %v733_v46 = vld [vmem:[%s1140_s2 + $0x8] sm:$0xf]  ;;  %vm619_vm8 = vcmask 1043456  }
  0x12   :  { %219 = vmatpush.bf16.msra.mxu3 %v694_v47  ;;  %v839_v47 = vld [vmem:[%s1140_s2 + $0x2c] sm:$0xf0] }
  0x13   :  { %675 = vmatmul.msk.bf16.vlgmr.msra.gmra.mxu0 %vm92_vm0, %v813_v48 }
  0x14   :  { %677 = vmatmul.msk.bf16.vlgmr.msra.gmra.mxu1 %vm92_vm0, %v813_v48  ;;  %719 = vmatmul.msk.bf16.vlgmr.msra.gmra.mxu2 %vm92_vm0, %v815_v49  ;;  %v834_v48 = vld [vmem:[%s1140_s2 + $0xc] sm:$0xf] }
  0x15   :  { %721 = vmatmul.msk.bf16.vlgmr.msra.gmra.mxu3 %vm92_vm0, %v815_v49  ;;  %474 = vmatpush.bf16.msrb.mxu0 %v766_v31 }
  0x16   :  { %487 = vmatpush.bf16.msrb.mxu1 %v770_v33  ;;  %500 = vmatpush.bf16.msrb.mxu2 %v774_v37 }
  0x17   :  { %513 = vmatpush.bf16.msrb.mxu3 %v778_v39 }
  0x19   :  { %475 = vmatpush.bf16.msrb.mxu0 %v726_v43 }
  0x1a   :  { %488 = vmatpush.bf16.msrb.mxu1 %v730_v45 }
  0x23   :  { %676 = vmatmul.msk.bf16.gmra.mxu0 %vm92_vm0, %v814_v50 }
  0x24   :  { %678 = vmatmul.msk.bf16.gmra.mxu1 %vm92_vm0, %v814_v50  ;;  %720 = vmatmul.msk.bf16.gmra.mxu2 %vm92_vm0, %v816_v51  ;;  %v734_v50 = vor.u32 %v839_v47, %v733_v46 }
  0x25   :  { %722 = vmatmul.msk.bf16.gmra.mxu3 %vm92_vm0, %v816_v51  ;;  %v735_v51 = vld [vmem:[%s1140_s2 + $0x30] sm:$0xf0] }
  0x26   :  { %501 = vmatpush.bf16.msrb.mxu2 %v734_v50 }
  0x90   :  { %v108_v52 = vpop.f32.mrf.mxu0 }
  0x91   :  { %v231_v53 = vmax.f32 %v108_v52, 0.0  ;;  %v127_v54 = vpop.f32.mrf.mxu1  ;;  %v738_v52 = vor.u32 %v834_v48, %v735_v51 }
  0x92   :  { %v232_v55 = vmax.f32 %v127_v54, 0.0  ;;  %v781_v54 = vld [vmem:[%s1140_s2 + $0x60] sm:$0xf] }
  0x93   :  { %514 = vmatpush.bf16.msrb.mxu3 %v738_v52 }
  0x94   :  { %v247_v56 = vadd.f32 %v232_v55, %v231_v53  ;;  %v850_v55 = vld [vmem:[%s1140_s2 + $0x84] sm:$0xf0] }
  0x96   :  { %248 = vadd.xlane.f32.xlu0 %v247_v56  ;;  %v845_v56 = vld [vmem:[%s1140_s2 + $0x64] sm:$0xf] }
  0x97   :  { %v202_v57 = vpop.f32.mrf.mxu2 }
  0x98   :  { %v239_v58 = vmax.f32 %v202_v57, 0.0  ;;  %v221_v59 = vpop.f32.mrf.mxu3  ;;  %v110_v60 = vpop.f32.mrf.mxu0  ;;  %v782_v57 = vor.u32 %v850_v55, %v781_v54 }
  0x99   :  { %v240_v61 = vmax.f32 %v221_v59, 0.0  ;;  %v233_v62 = vmax.f32 %v110_v60, 0.0  ;;  %v129_v63 = vpop.f32.mrf.mxu1  ;;  %v741_v59 = vld [vmem:[%s1140_s2 + $0x10] sm:$0xf]  ;;  %v840_v60 = vld [vmem:[%s1140_s2 + $0x34] sm:$0xf0] }
  0x9a   :  { %v234_v0 = vmax.f32 %v129_v63, 0.0  ;;  %v835_v63 = vld [vmem:[%s1140_s2 + $0x14] sm:$0xf]  ;;  %526 = vmatpush.bf16.msra.mxu0 %v782_v57 }
  0x9b   :  { %v259_v1 = vadd.f32 %v240_v61, %v239_v58  ;;  %v783_v58 = vld [vmem:[%s1140_s2 + $0x88] sm:$0xf0] }
  0x9c   :  { %v250_v2 = vadd.f32 %v234_v0, %v233_v62  ;;  %v786_v62 = vor.u32 %v845_v56, %v783_v58  ;;  %v743_v0 = vld [vmem:[%s1140_s2 + $0x38] sm:$0xf0]  ;;  %v797_v56 = vld [vmem:[%s1140_s2 + $0x70] sm:$0xf]  ;;  %v852_v58 = vld [vmem:[%s1140_s2 + $0x94] sm:$0xf0] }
  0x9d   :  { %260 = vadd.xlane.f32.xlu1 %v259_v1  ;;  %v742_v1 = vor.u32 %v840_v60, %v741_v59  ;;  %v847_v59 = vld [vmem:[%s1140_s2 + $0x74] sm:$0xf]  ;;  %v799_v60 = vld [vmem:[%s1140_s2 + $0x98] sm:$0xf0] }
  0x9e   :  { %251 = vadd.xlane.f32.xlu0 %v250_v2  ;;  %v789_v2 = vld [vmem:[%s1140_s2 + $0x68] sm:$0xf]  ;;  %539 = vmatpush.bf16.msra.mxu1 %v786_v62 }
  0x9f   :  { %v204_v3 = vpop.f32.mrf.mxu2  ;;  %527 = vmatpush.bf16.msra.mxu0 %v742_v1  ;;  %v798_v1 = vor.u32 %v852_v58, %v797_v56 }
  0xa0   :  { %v241_v4 = vmax.f32 %v204_v3, 0.0  ;;  %v223_v5 = vpop.f32.mrf.mxu3  ;;  %v113_v6 = vpop.f32.mrf.mxu0  ;;  %v851_v3 = vld [vmem:[%s1140_s2 + $0x8c] sm:$0xf0] }
  0xa1   :  { %v242_v7 = vmax.f32 %v223_v5, 0.0  ;;  %v235_v8 = vmax.f32 %v113_v6, 0.0  ;;  %v132_v9 = vpop.f32.mrf.mxu1  ;;  %v746_v5 = vor.u32 %v835_v63, %v743_v0  ;;  %v790_v6 = vor.u32 %v851_v3, %v789_v2  ;;  %v757_v3 = vld [vmem:[%s1140_s2 + $0x20] sm:$0xf] }
  0xa2   :  { %v236_v10 = vmax.f32 %v132_v9, 0.0  ;;  %v749_v9 = vld [vmem:[%s1140_s2 + $0x18] sm:$0xf]  ;;  %v802_v2 = vor.u32 %v847_v59, %v799_v60 }
  0xa3   :  { %v262_v11 = vadd.f32 %v242_v7, %v241_v4  ;;  %v846_v7 = vld [vmem:[%s1140_s2 + $0x6c] sm:$0xf]  ;;  %552 = vmatpush.bf16.msra.mxu2 %v790_v6  ;;  %540 = vmatpush.bf16.msra.mxu1 %v746_v5  ;;  %v837_v5 = vld [vmem:[%s1140_s2 + $0x24] sm:$0xf] }
  0xa4   :  { %v253_v12 = vadd.f32 %v236_v10, %v235_v8  ;;  %v791_v8 = vld [vmem:[%s1140_s2 + $0x90] sm:$0xf0]  ;;  %v759_v6 = vld [vmem:[%s1140_s2 + $0x48] sm:$0xf0] }
  0xa5   :  { %263 = vadd.xlane.f32.xlu1 %v262_v11  ;;  %v794_v10 = vor.u32 %v846_v7, %v791_v8  ;;  %v841_v11 = vld [vmem:[%s1140_s2 + $0x3c] sm:$0xf0]  ;;  %v762_v8 = vor.u32 %v837_v5, %v759_v6 }
  0xa6   :  { %254 = vadd.xlane.f32.xlu2 %v253_v12  ;;  %v836_v12 = vld [vmem:[%s1140_s2 + $0x1c] sm:$0xf] }
  0xa7   :  { %v207_v13 = vpop.f32.mrf.mxu2  ;;  %565 = vmatpush.bf16.msra.mxu3 %v794_v10 }
  0xa8   :  { %v243_v14 = vmax.f32 %v207_v13, 0.0  ;;  %v226_v15 = vpop.f32.mrf.mxu3  ;;  %v115_v16 = vpop.f32.mrf.mxu0  ;;  %v751_v13 = vld [vmem:[%s1140_s2 + $0x40] sm:$0xf0] }
  0xa9   :  { %v244_v17 = vmax.f32 %v226_v15, 0.0  ;;  %v237_v18 = vmax.f32 %v115_v16, 0.0  ;;  %v134_v19 = vpop.f32.mrf.mxu1  ;;  %v750_v16 = vor.u32 %v841_v11, %v749_v9  ;;  %v303_v9 = vld [vmem:[%s1141_s3] sm:$0xff] }
  0xaa   :  { %v238_v20 = vmax.f32 %v134_v19, 0.0  ;;  %v308_v11 = vperm.slane %v303_v9, 1 }
  0xab   :  { %v265_v21 = vadd.f32 %v244_v17, %v243_v14  ;;  %v339_v14 = vlaneseq  ;;  %553 = vmatpush.bf16.msra.mxu2 %v750_v16  ;;  %v307_v16 = vperm.slane %v303_v9, 0 }
  0xac   :  { %v256_v22 = vadd.f32 %v238_v20, %v237_v18  ;;  %v754_v18 = vor.u32 %v836_v12, %v751_v13 }
  0xad   :  { %266 = vadd.xlane.f32.xlu0 %v265_v21  ;;  %v340_v21 = vand.u32 127, %v339_v14  ;;  %v309_v14 = vperm.slane %v303_v9, 2 }
  0xae   :  { %257 = vadd.xlane.f32.xlu2 %v256_v22  ;;  %566 = vmatpush.bf16.msra.mxu3 %v754_v18 }
  0xaf   :  { %v209_v23 = vpop.f32.mrf.mxu2  ;;  %v342_v29 = vadd.s32 4294967288, %v340_v21  ;;  %v346_v33 = vadd.s32 4294967280, %v340_v21  ;;  %v350_v42 = vadd.s32 4294967272, %v340_v21 }
  0xb0   :  { %v245_v24 = vmax.f32 %v209_v23, 0.0  ;;  %v228_v25 = vpop.f32.mrf.mxu3 }
  0xb1   :  { %v246_v26 = vmax.f32 %v228_v25, 0.0 }
  0xb3   :  { %v268_v27 = vadd.f32 %v246_v26, %v245_v24 }
  0xb5   :  { %269 = vadd.xlane.f32.xlu1 %v268_v27 }
 0x109   :  { %v249_v49 = vpop.xlane.xlu0 %248 }
 0x10a   :  { %v271_v19 = vmul.f32 0.00390625, %v249_v49 }
 0x110   :  { %v261_v53 = vpop.xlane.xlu1 %260 }
 0x111   :  { %v252_v4 = vpop.xlane.xlu0 %251  ;;  %v275_v23 = vmul.f32 0.00390625, %v261_v53 }
 0x112   :  { %v272_v17 = vmul.f32 0.00390625, %v252_v4  ;;  %v842_v4 = vld [vmem:[%s1140_s2 + $0x44] sm:$0xf0] }
 0x113   :  { %v758_v7 = vor.u32 %v842_v4, %v757_v3 }
 0x114   :  { %v279_v24 = vpack.c.bf16 %v272_v17, %v271_v19 }
 0x116   :  { %v331_v30 = vunpack.c.l.b16 %v279_v24  ;;  %v332_v31 = vunpack.c.h.b16 %v279_v24 }
 0x118   :  { %v264_v15 = vpop.xlane.xlu1 %263  ;;  %v341_v40 = vperm.slane %v331_v30, %v340_v21  ;;  %v343_v41 = vperm.slane %v332_v31, %v342_v29 }
 0x119   :  { %v255_v61 = vpop.xlane.xlu2 %254  ;;  %v276_v20 = vmul.f32 0.00390625, %v264_v15  ;;  %v310_v15 = vperm.slane %v303_v9, 3 }
 0x11a   :  { %v273_v25 = vmul.f32 0.00390625, %v255_v61  ;;  %v345_v50 = vsel %vm344_vm1, %v343_v41, %v341_v40 }
 0x11b   :  { %v281_v27 = vpack.c.bf16 %v276_v20, %v275_v23 }
 0x11d   :  { %v335_v35 = vunpack.c.l.b16 %v281_v27  ;;  %v336_v36 = vunpack.c.h.b16 %v281_v27 }
 0x11f   :  { %v354_v46 = vperm.slane %v335_v35, %v340_v21  ;;  %v355_v47 = vperm.slane %v336_v36, %v342_v29  ;;  %v313_v36 = vperm.slane %v303_v9, 6 }
 0x120   :  { %v267_v32 = vpop.xlane.xlu0 %266 }
 0x121   :  { %v258_v22 = vpop.xlane.xlu2 %257  ;;  %v277_v38 = vmul.f32 0.00390625, %v267_v32  ;;  %v356_v55 = vsel %vm344_vm1, %v355_v47, %v354_v46 }
 0x122   :  { %v274_v26 = vmul.f32 0.00390625, %v258_v22 }
 0x124   :  { %v280_v28 = vpack.c.bf16 %v274_v26, %v273_v25 }
 0x126   :  { %v333_v34 = vunpack.c.l.b16 %v280_v28  ;;  %v334_v43 = vunpack.c.h.b16 %v280_v28 }
 0x128   :  { %v270_v37 = vpop.xlane.xlu1 %269  ;;  %v347_v44 = vperm.slane %v333_v34, %v346_v33  ;;  %v351_v51 = vperm.slane %v334_v43, %v350_v42 }
 0x129   :  { %v278_v39 = vmul.f32 0.00390625, %v270_v37  ;;  %v314_v37 = vperm.slane %v303_v9, 7 }
 0x12a   :  { %v349_v52 = vsel %vm348_vm2, %v347_v44, %v345_v50 }
 0x12b   :  { %v282_v45 = vpack.c.bf16 %v278_v39, %v277_v38  ;;  %v353_v61 = vsel %vm352_vm3, %v351_v51, %v349_v52  ;;  %v311_v38 = vperm.slane %v303_v9, 4 }
 0x12d   :  { %v337_v48 = vunpack.c.l.b16 %v282_v45  ;;  %v338_v49 = vunpack.c.h.b16 %v282_v45 }
 0x12f   :  { %v357_v53 = vperm.slane %v337_v48, %v346_v33  ;;  %v359_v54 = vperm.slane %v338_v49, %v350_v42  ;;  %v312_v33 = vperm.slane %v303_v9, 5  ;;  %v304_v49 = vld [vmem:[%s1141_s3 + $0x8] sm:$0x3] }
 0x130   :  { %v315_v56 = vperm.slane %v304_v49, 0 }
 0x131   :  { %v358_v57 = vsel %vm348_vm2, %v357_v53, %v356_v55  ;;  %v316_v53 = vperm.slane %v304_v49, 1 }
 0x132   :  { %v360_v62 = vsel %vm352_vm3, %v359_v54, %v358_v57 }
 0x133   :  { %v362_v63 = vsel %vm361_vm4, %v360_v62, %v353_v61 }
 0x134   :  { %v363_v0 = vpack.c.b16 %v362_v63, %v362_v63 }
 0x136   :  { %803 = vmatmul.msk.bf16.vlgmr.msrb.gmra.mxu0 %vm464_vm5, %v363_v0  ;;  %804 = vmatmul.msk.bf16.vlgmr.msrb.gmra.mxu1 %vm464_vm5, %v363_v0 }
 0x137   :  { %805 = vmatmul.msk.bf16.vlgmr.msrb.gmra.mxu2 %vm464_vm5, %v363_v0  ;;  %806 = vmatmul.msk.bf16.vlgmr.msrb.gmra.mxu3 %vm464_vm5, %v363_v0 }
 0x138   :  { %578 = vmatpush.bf16.msrb.mxu0 %v798_v1  ;;  %591 = vmatpush.bf16.msrb.mxu1 %v802_v2 }
 0x13c   :  { %579 = vmatpush.bf16.msrb.mxu0 %v758_v7  ;;  %592 = vmatpush.bf16.msrb.mxu1 %v762_v8 }
 0x146   :  { %807 = vmatmul.msk.bf16.vlgmr.msra.gmra.mxu0 %vm464_vm5, %v363_v0  ;;  %808 = vmatmul.msk.bf16.vlgmr.msra.gmra.mxu1 %vm464_vm5, %v363_v0 }
 0x147   :  { %809 = vmatmul.msk.bf16.vlgmr.msra.gmra.mxu2 %vm464_vm5, %v363_v0  ;;  %810 = vmatmul.msk.bf16.vlgmr.msra.gmra.mxu3 %vm464_vm5, %v363_v0 }
 0x156   :  { %811 = vmatmul.msk.bf16.vlgmr.msrb.gmra.mxu0 %vm464_vm5, %v363_v0  ;;  %812 = vmatmul.msk.bf16.vlgmr.msrb.gmra.mxu1 %vm464_vm5, %v363_v0 }
 0x1b3   :  { %v477_v10 = vpop.f32.mrf.mxu0  ;;  %v490_v12 = vpop.f32.mrf.mxu1 }
 0x1b4   :  { %v491_v13 = vadd.f32 %v490_v12, %v308_v11  ;;  %v478_v24 = vadd.f32 %v477_v10, %v307_v16 }
 0x1b6   :  { %v608_v19 = vrot.slane %v491_v13, 6 }
 0x1b8   :  { %v616_v27 = vsel %vm615_vm6, %v478_v24, %v608_v19 }
 0x1ba   :  { %v503_v17 = vpop.f32.mrf.mxu2  ;;  %v516_v18 = vpop.f32.mrf.mxu3 }
 0x1bb   :  { %v504_v20 = vadd.f32 %v503_v17, %v309_v14  ;;  %v517_v21 = vadd.f32 %v516_v18, %v310_v15  ;;  %v479_v22 = vpop.f32.mrf.mxu0  ;;  %v492_v23 = vpop.f32.mrf.mxu1 }
 0x1bd   :  { %v609_v25 = vrot.slane %v504_v20, 4  ;;  %v610_v26 = vrot.slane %v517_v21, 2 }
 0x1bf   :  { %v618_v28 = vsel %vm617_vm7, %v609_v25, %v610_v26 }
 0x1c0   :  { %v620_v29 = vsel %vm619_vm8, %v616_v27, %v618_v28 }
 0x1c1   :  { %628 = vst [vmem:[%s1142_s4] sm:$0xff] %v620_v29 }
 0x1c2   :  { %v505_v30 = vpop.f32.mrf.mxu2  ;;  %v518_v31 = vpop.f32.mrf.mxu3 }
 0x1c3   :  { %v529_v32 = vpop.f32.mrf.mxu0  ;;  %v542_v34 = vpop.f32.mrf.mxu1 }
 0x1c4   :  { %v543_v35 = vadd.f32 %v542_v34, %v312_v33  ;;  %v530_v46 = vadd.f32 %v529_v32, %v311_v38 }
 0x1c6   :  { %v611_v41 = vrot.slane %v543_v35, 6 }
 0x1c8   :  { %v621_v50 = vsel %vm615_vm6, %v530_v46, %v611_v41 }
 0x1ca   :  { %v555_v39 = vpop.f32.mrf.mxu2  ;;  %v568_v40 = vpop.f32.mrf.mxu3 }
 0x1cb   :  { %v556_v42 = vadd.f32 %v555_v39, %v313_v36  ;;  %v569_v43 = vadd.f32 %v568_v40, %v314_v37  ;;  %v531_v44 = vpop.f32.mrf.mxu0  ;;  %v544_v45 = vpop.f32.mrf.mxu1 }
 0x1cd   :  { %v612_v47 = vrot.slane %v556_v42, 4  ;;  %v613_v48 = vrot.slane %v569_v43, 2 }
 0x1cf   :  { %v622_v51 = vsel %vm617_vm7, %v612_v47, %v613_v48 }
 0x1d0   :  { %v623_v52 = vsel %vm619_vm8, %v621_v50, %v622_v51 }
 0x1d1   :  { %629 = vst [vmem:[%s1142_s4 + $0x8] sm:$0xff] %v623_v52 }
 0x1d2   :  { %v557_v54 = vpop.f32.mrf.mxu2  ;;  %v570_v55 = vpop.f32.mrf.mxu3 }
 0x1d3   :  { %v581_v57 = vpop.f32.mrf.mxu0  ;;  %v594_v58 = vpop.f32.mrf.mxu1 }
 0x1d4   :  { %v595_v59 = vadd.f32 %v594_v58, %v316_v53  ;;  %v582_v60 = vadd.f32 %v581_v57, %v315_v56 }
 0x1d6   :  { %v614_v61 = vrot.slane %v595_v59, 6 }
 0x1d8   :  { %v624_v62 = vsel %vm615_vm6, %v582_v60, %v614_v61 }
 0x1d9   :  { %630 = vst [vmem:[%s1142_s4 + $0x10] sm:$0xf] %v624_v62 }
 0x1db   :  { %v583_v63 = vpop.f32.mrf.mxu0  ;;  %v596_v0 = vpop.f32.mrf.mxu1 }

</bundles_post_ra>
